<compile_context>
chip_gen: v5e
topology: v5e:2x2
jax: 0.10.0
libtpu: 0.0.40
codegen_flags: <defaults>
</compile_context>

<pallas_src>
import math

import jax
import jax.numpy as jnp
from jax import lax
from jax.experimental import pallas as pl
from jax.experimental.pallas import tpu as pltpu

# TODO(synk): reverse_normalize() is not defined in the provided snippet; it is
# implemented here as a deterministic affine denormalization x*STD + MEAN, and
# the target's (H, W) is assumed to already match the input's (resize = identity).
_REV_MEAN = 0.5
_REV_STD = 2.0

_LANE = 128
_SUBLANE = 8


def _sse_kernel(x_ref, t_ref, out_ref, acc_ref):
    """Accumulates sum((denorm(x) - t)^2) for one (sample, split) over chunks."""
    c = pl.program_id(2)

    @pl.when(c == 0)
    def _():
        acc_ref[...] = jnp.zeros_like(acc_ref)

    rows = x_ref.shape[0]
    n_groups = rows // _SUBLANE
    rem = rows - n_groups * _SUBLANE

    if n_groups > 0:
        # Per-sublane-group accumulation keeps the working set to a few vregs;
        # the full (rows, lanes) squared-error tensor is never materialized.
        def body(g, carry):
            r0 = pl.multiple_of(g * _SUBLANE, _SUBLANE)
            xg = x_ref[pl.ds(r0, _SUBLANE), :].astype(jnp.float32)
            tg = t_ref[pl.ds(r0, _SUBLANE), :].astype(jnp.float32)
            d = (xg * _REV_STD + _REV_MEAN) - tg
            acc_ref[...] = acc_ref[...] + d * d
            return carry

        unroll = True if n_groups <= 8 else 8
        lax.fori_loop(0, n_groups, body, 0, unroll=unroll)

    if rem > 0:  # only possible in the single-chunk (rows == full extent) case
        start = n_groups * _SUBLANE
        xg = x_ref[pl.ds(start, rem), :].astype(jnp.float32)
        tg = t_ref[pl.ds(start, rem), :].astype(jnp.float32)
        d = (xg * _REV_STD + _REV_MEAN) - tg
        acc_ref[pl.ds(0, rem), :] = acc_ref[pl.ds(0, rem), :] + d * d

    @pl.when(c == pl.num_programs(2) - 1)
    def _():
        out_ref[...] = jnp.full(out_ref.shape, jnp.sum(acc_ref[...]),
                                dtype=out_ref.dtype)


def _per_sample_sse_xla(x, t):
    xf = x.astype(jnp.float32) * _REV_STD + _REV_MEAN
    d = xf - t.astype(jnp.float32)
    return jnp.sum(d * d, axis=tuple(range(1, x.ndim)))


def _reduce(rmse, reduction):
    if reduction == "mean":
        return jnp.mean(rmse)
    if reduction == "sum":
        return jnp.sum(rmse)
    if reduction == "none":
        return rmse
    raise ValueError(f"Unknown reduction: {reduction}")


def rmse_loss(x, t, reduction="mean", *, target_chunk_elems=1 << 20):
    """Pallas implementation of RMSELoss.forward (per-sample RMSE + reduction)."""
    assert t.shape == x.shape, "target dims must match input dims"
    B = x.shape[0]
    n = math.prod(int(s) for s in x.shape[1:])

    # Widest lane count that divides the per-sample element count exactly, so
    # the (B, rows, lanes) view is a free bitcast reshape (no pad, no copy).
    lanes = 0
    for cand in (4 * _LANE, 2 * _LANE, _LANE):
        if n % cand == 0:
            lanes = cand
            break
    if lanes == 0:
        # Sample size not a multiple of 128: a fused single-pass XLA reduction
        # is already HBM-roofline-bound; a Pallas path would require a padded
        # copy (extra HBM traffic), so skip the kernel for this rare case.
        rmse = jnp.sqrt(_per_sample_sse_xla(x, t) * (1.0 / n))
        return _reduce(rmse, reduction)

    rows_all = n // lanes
    xr = x.reshape(B, rows_all, lanes)
    tr = t.reshape(B, rows_all, lanes)

    # ~4 MiB f32 per input per chunk; never round rows UP to a chunk multiple.
    chunk_target = max(_SUBLANE,
                       (target_chunk_elems // lanes) // _SUBLANE * _SUBLANE)
    if rows_all <= chunk_target:
        chunk_rows = rows_all                 # single chunk == full extent
    else:
        chunk_rows = chunk_target
        cand_rows = chunk_target              # prefer a divisor near the target
        while cand_rows >= chunk_target // 2:
            if rows_all % cand_rows == 0:
                chunk_rows = cand_rows
                break
            cand_rows -= _SUBLANE
    n_chunks = rows_all // chunk_rows
    rows_bulk = n_chunks * chunk_rows         # kernel reads only these rows

    # Split the reduction across two parallel grid slots when possible so a
    # v7x megacore stays busy even for B == 1 (near-zero impact on v5e/v6e).
    n_splits = 2 if (n_chunks >= 2 and n_chunks % 2 == 0) else 1
    cps = n_chunks // n_splits                # chunks per (sample, split)

    in_map = lambda b, s, c: (b, s * cps + c, 0)

    itemsize = x.dtype.itemsize + t.dtype.itemsize
    cost = pl.CostEstimate(
        flops=5 * B * rows_bulk * lanes,
        transcendentals=0,
        bytes_accessed=B * rows_bulk * lanes * itemsize
        + B * n_splits * _SUBLANE * _LANE * 4,
    )

    out = pl.pallas_call(
        _sse_kernel,
        out_shape=jax.ShapeDtypeStruct((B, n_splits, _SUBLANE, _LANE),
                                       jnp.float32),
        grid_spec=pltpu.PrefetchScalarGridSpec(
            num_scalar_prefetch=0,
            grid=(B, n_splits, cps),
            in_specs=[
                pl.BlockSpec((pl.Squeezed(), chunk_rows, lanes), in_map),
                pl.BlockSpec((pl.Squeezed(), chunk_rows, lanes), in_map),
            ],
            out_specs=pl.BlockSpec(
                (pl.Squeezed(), pl.Squeezed(), _SUBLANE, _LANE),
                lambda b, s, c: (b, s, 0, 0)),
            scratch_shapes=[pltpu.VMEM((_SUBLANE, lanes), jnp.float32)],
        ),
        compiler_params=pltpu.CompilerParams(
            dimension_semantics=("parallel", "parallel", "arbitrary"),
            vmem_limit_bytes=32 * 1024 * 1024,
        ),
        cost_estimate=cost,
    )(xr, tr)

    sse = jnp.sum(out[:, :, 0, 0], axis=1)                       # (B,)

    if rows_bulk < rows_all:
        # Leftover rows (< one chunk): fused XLA reduce that reads only the
        # tail from HBM — no pad, no copy of the bulk.
        xt = xr[:, rows_bulk:, :].astype(jnp.float32) * _REV_STD + _REV_MEAN
        tt = tr[:, rows_bulk:, :].astype(jnp.float32)
        sse = sse + jnp.sum((xt - tt) ** 2, axis=(1, 2))

    rmse = jnp.sqrt(sse * (1.0 / n))          # true element count, not padded
    return _reduce(rmse, reduction)


def _reference(x, t, reduction="mean"):
    x = x.astype(jnp.float32) * _REV_STD + _REV_MEAN
    t = t.astype(jnp.float32)
    mse = jnp.mean((x - t) ** 2, axis=tuple(range(1, x.ndim)))
    return _reduce(jnp.sqrt(mse), reduction)


if __name__ == "__main__":
    key = jax.random.PRNGKey(0)

    cases = [
        ((2, 4, 16, 16), jnp.float32),    # single tiny chunk (remainder path)
        ((2, 3, 160, 160), jnp.float32),  # single chunk, loop + remainder rows
        ((1, 8, 512, 512), jnp.float32),  # multi-chunk, 2-way split, no tail
        ((1, 257, 64, 64), jnp.float32),  # multi-row sample with XLA row tail
        ((2, 3, 15, 15), jnp.float32),    # non-128-divisible -> fused XLA path
        ((2, 4, 16, 16), jnp.bfloat16),   # low-precision inputs
    ]

    ok = True
    for shape, dtype in cases:
        key, kx, kt = jax.random.split(key, 3)
        x = jax.random.normal(kx, shape, dtype=jnp.float32).astype(dtype)
        t = jax.random.normal(kt, shape, dtype=jnp.float32).astype(dtype)
        for red in ("mean", "sum", "none"):
            got = jax.block_until_ready(rmse_loss(x, t, reduction=red))
            ref = _reference(x, t, reduction=red)
            ok = ok and bool(jnp.allclose(got, ref, rtol=1e-4, atol=1e-5))
    assert ok

    print("KERNEL_OK")
</pallas_src>

<mosaic_0001>
module attributes {stable_mosaic.version = 11 : i64} {
  func.func @_sse_kernel(%arg0: i32, %arg1: i32, %arg2: i32, %arg3: memref<1x2x512xf32, #tpu.memory_space<vmem>>, %arg4: memref<1x2x512xf32, #tpu.memory_space<vmem>>, %arg5: memref<1x1x8x128xf32, #tpu.memory_space<vmem>>, %arg6: memref<8x512xf32, #tpu.memory_space<vmem>>) attributes {dimension_semantics = [#tpu.dimension_semantics<parallel>, #tpu.dimension_semantics<parallel>, #tpu.dimension_semantics<arbitrary>], iteration_bounds = array<i64: 2, 1, 1>, scalar_prefetch = 0 : i64, scratch_operands = 1 : i64, tpu.core_type = #tpu.core_type<tc>, window_params = [{transform_indices = @transform_0, window_bounds = array<i64: 1, 2, 512>}, {transform_indices = @transform_1, window_bounds = array<i64: 1, 2, 512>}, {transform_indices = @transform_2, window_bounds = array<i64: 1, 1, 8, 128>}]} {
    %c0_i32 = arith.constant 0 : i32
    %0 = arith.cmpi eq, %arg2, %c0_i32 : i32
    %1 = arith.extui %0 : i1 to i32
    %c0_i32_0 = arith.constant 0 : i32
    %2 = arith.cmpi ne, %1, %c0_i32_0 : i32
    scf.if %2 {
      %cst_13 = arith.constant 0.000000e+00 : f32
      %19 = vector.broadcast %cst_13 : f32 to vector<8x512xf32>
      %c0_14 = arith.constant 0 : index
      %c0_15 = arith.constant 0 : index
      %20 = vector.load %arg6[%c0_14, %c0_15] : memref<8x512xf32, #tpu.memory_space<vmem>>, vector<8x512xf32>
      tpu.vector_store %arg6[%c0_14, %c0_15], %19 {strides = array<i32>} : memref<8x512xf32, #tpu.memory_space<vmem>>, vector<8x512xf32>,
    } else {
    }
    %c0 = arith.constant 0 : index
    %c0_1 = arith.constant 0 : index
    %c0_2 = arith.constant 0 : index
    %3 = vector.load %arg3[%c0, %c0_1, %c0_2] : memref<1x2x512xf32, #tpu.memory_space<vmem>>, vector<1x2x512xf32>
    %4 = vector.shape_cast %3 : vector<1x2x512xf32> to vector<2x512xf32>
    %c0_3 = arith.constant 0 : index
    %c0_4 = arith.constant 0 : index
    %c0_5 = arith.constant 0 : index
    %5 = vector.load %arg4[%c0_3, %c0_4, %c0_5] : memref<1x2x512xf32, #tpu.memory_space<vmem>>, vector<1x2x512xf32>
    %6 = vector.shape_cast %5 : vector<1x2x512xf32> to vector<2x512xf32>
    %cst = arith.constant 2.000000e+00 : f32
    %7 = vector.broadcast %cst : f32 to vector<2x512xf32>
    %8 = arith.mulf %4, %7 : vector<2x512xf32>
    %cst_6 = arith.constant 5.000000e-01 : f32
    %9 = vector.broadcast %cst_6 : f32 to vector<2x512xf32>
    %10 = arith.addf %8, %9 : vector<2x512xf32>
    %11 = arith.subf %10, %6 : vector<2x512xf32>
    %c0_7 = arith.constant 0 : index
    %c0_8 = arith.constant 0 : index
    %12 = vector.load %arg6[%c0_7, %c0_8] : memref<8x512xf32, #tpu.memory_space<vmem>>, vector<2x512xf32>
    %13 = arith.mulf %11, %11 : vector<2x512xf32>
    %14 = arith.addf %12, %13 : vector<2x512xf32>
    %c0_9 = arith.constant 0 : index
    %c0_10 = arith.constant 0 : index
    %15 = vector.load %arg6[%c0_9, %c0_10] : memref<8x512xf32, #tpu.memory_space<vmem>>, vector<2x512xf32>
    tpu.vector_store %arg6[%c0_9, %c0_10], %14 {strides = array<i32>} : memref<8x512xf32, #tpu.memory_space<vmem>>, vector<2x512xf32>,
    %c0_i32_11 = arith.constant 0 : i32
    %16 = arith.cmpi eq, %arg2, %c0_i32_11 : i32
    %17 = arith.extui %16 : i1 to i32
    %c0_i32_12 = arith.constant 0 : i32
    %18 = arith.cmpi ne, %17, %c0_i32_12 : i32
    scf.if %18 {
      %c0_13 = arith.constant 0 : index
      %c0_14 = arith.constant 0 : index
      %19 = vector.load %arg6[%c0_13, %c0_14] : memref<8x512xf32, #tpu.memory_space<vmem>>, vector<8x512xf32>
      %20 = vector.shape_cast %19 : vector<8x512xf32> to vector<1x8x512xf32>
      %cst_15 = arith.constant dense<0.000000e+00> : vector<1xf32>
      %21 = vector.multi_reduction <add>, %20, %cst_15 [1, 2] : vector<1x8x512xf32> to vector<1xf32>
      %22 = vector.shape_cast %21 : vector<1xf32> to vector<1x1x1xf32>
      %23 = vector.extract %22[0, 0, 0] : f32 from vector<1x1x1xf32>
      %24 = vector.broadcast %23 : f32 to vector<8x128xf32>
      %c0_16 = arith.constant 0 : index
      %c0_17 = arith.constant 0 : index
      %c0_18 = arith.constant 0 : index
      %c0_19 = arith.constant 0 : index
      %25 = vector.load %arg5[%c0_16, %c0_17, %c0_18, %c0_19] : memref<1x1x8x128xf32, #tpu.memory_space<vmem>>, vector<1x1x8x128xf32>
      %26 = vector.shape_cast %25 : vector<1x1x8x128xf32> to vector<8x128xf32>
      %27 = vector.shape_cast %24 : vector<8x128xf32> to vector<1x1x8x128xf32>
      tpu.vector_store %arg5[%c0_16, %c0_17, %c0_18, %c0_19], %27 {strides = array<i32>} : memref<1x1x8x128xf32, #tpu.memory_space<vmem>>, vector<1x1x8x128xf32>,
    } else {
    }
    return
  }
  func.func @transform_0(%arg0: i32, %arg1: i32, %arg2: i32) -> (i32, i32, i32) {
    %c1_i32 = arith.constant 1 : i32
    %0 = arith.muli %arg1, %c1_i32 : i32
    %1 = arith.addi %0, %arg2 : i32
    %c0_i32 = arith.constant 0 : i32
    %c0_i32_0 = arith.constant 0 : i32
    return %arg0, %1, %c0_i32 : i32, i32, i32
  }
  func.func @transform_1(%arg0: i32, %arg1: i32, %arg2: i32) -> (i32, i32, i32) {
    %c1_i32 = arith.constant 1 : i32
    %0 = arith.muli %arg1, %c1_i32 : i32
    %1 = arith.addi %0, %arg2 : i32
    %c0_i32 = arith.constant 0 : i32
    %c0_i32_0 = arith.constant 0 : i32
    return %arg0, %1, %c0_i32 : i32, i32, i32
  }
  func.func @transform_2(%arg0: i32, %arg1: i32, %arg2: i32) -> (i32, i32, i32, i32) {
    %c0_i32 = arith.constant 0 : i32
    %c0_i32_0 = arith.constant 0 : i32
    %c0_i32_1 = arith.constant 0 : i32
    return %arg0, %arg1, %c0_i32, %c0_i32_0 : i32, i32, i32, i32
  }
}

</mosaic_0001>

<bundles_post_ra>
// kernel: tpu_custom_call.1
= control target key start
LH: loop header
LB: loop body
LE: loop exit
PB: predicated region body
PF: predicated region fallthrough
CT: control target
= control target key end

     0   :  { %7 = vsyncpa [#allocation4], 0  ;;  %s813_s0 = inlined_call_operand.hbm [shape: f32[2,2,512], index: 0, kind: input, shape index: {}]   ;;  %s814_s1 = inlined_call_operand.hbm [shape: f32[2,2,512], index: 1, kind: input, shape index: {}]   ;;  %s815_s2 = inlined_call_operand.hbm [shape: f32[2,1,8,128], index: 2, kind: output, shape index: {}]  }
   0x1   :  { %9 = vsyncpa [#allocation4 + $0x1], 0 }
   0x2   :  { %10 = vsyncpa [#allocation7], 0 }
   0x3   :  { %12 = vsyncpa [#allocation7 + $0x1], 0 }
   0x4   :  { %13 = vsyncpa [#allocation5], 0 }
   0x5   :  { %15 = vsyncpa [#allocation5 + $0x1], 0  ;;  %s680_s9 = smov 0   ;;  %s682_s10 = smov 0  }
   0x6   :  { %s684_s11 = smov 0   ;;  %s686_s12 = smov 0  }
   0x7   :  { %s688_s13 = smov 0   ;;  %s690_s14 = smov 0  }
   0x8 LB: > { %s426_s15 = sadd.s32 4294967295, %s662_s14   ;;  %s427_s16 = sadd.s32 4294967294, %s662_s14   ;;  %s662_s14 = sphi %s690_s14, %s21_s14   ;;  %s658_s13 = sphi %s688_s13, %s824_s13   ;;  %s654_s12 = sphi %s686_s12, %s823_s12   ;;  %s650_s11 = sphi %s684_s11, %s822_s11   ;;  %s646_s10 = sphi %s682_s10, %s821_s10   ;;  %s642_s9 = sphi %s680_s9, %s820_s9  }
   0x9   : > { %s40_s17 = sadd.s32 1, %s658_s13  ;;  %s51_s18 = sadd.s32 1, %s650_s11 }
   0xa   : > { %p42_p0 = scmp.ge.s32.totalorder %s40_s17, 2  ;;  %p58_p1 = scmp.ne.s32.totalorder %s650_s11, %s646_s10 }
   0xb   : > { %p59_p2 = scmp.eq.s32.totalorder %s662_s14, 0  ;;  %p64_p3 = scmp.ne.s32.totalorder %s646_s10, %s642_s9 }
   0xc   : > { %s826_s17 = smov (%p42_p0, %s40_s17), 0  ;;  %p65_p5 = scmp.eq.s32.totalorder %s426_s15, 0 }
   0xd   : > { %p721_p4 = por %p59_p2, %p58_p1  ;;  %s46_s20 = ssub.s32 %s658_s13, %s826_s17 }
   0xe   : > { %p120_p6 = scmp.eq.s32.totalorder %s426_s15, 1  ;;  %p49_p7 = scmp.eq.s32.totalorder %s46_s20, 0 }
   0xf   : > { %p727_p8 = por %p65_p5, %p64_p3  ;;  %p126_p10 = scmp.eq.s32.totalorder %s427_s16, 1 }
  0x10   : > { %p731_p9 = por %p120_p6, %p58_p1  ;;  %p429_p12 = scmp.ge.s32.totalorder %s662_s14, 2 }
  0x11   : > { %s736_s23 = scalar_select %p49_p7, %s650_s11, %s51_s18  }
  0x12   : > { %p738_p11 = por %p126_p10, %p64_p3  ;;  %p465_p13 = scmp.lt.s32.totalorder %s662_s14, 2 }
  0x13   : > { %s146_s25 = sand.u32 1, %s650_s11   ;;  %s444_s27 = sshll.u32 %s658_s13, 3 }
  0x14   : > { %s430_s26 = sshll.u32 %s146_s25, 3  ;;  %s158_s30 = scalar_lea.hbm %s813_s0, %s444_s27 }
  0x15   : > { %s150_s3 = scalar_lea.vmem [#allocation3], %s430_s26  ;;  %s160_s5 = sshll.u32 %s158_s30, 4  ;;  %s161_s5 = int_to_ptr.hbm [resolvable:$true] %s160_s5 }
  0x16   : > { %s162_s4 = sshll.u32 %s150_s3, 4  ;;  %p455_p0 = pnand %p465_p13, %p721_p4  ;;  %s163_s4 = int_to_ptr.vmem [resolvable:$true] %s162_s4 }
  0x17   : > { %p436_p1 = scmp.ge.s32.totalorder %s662_s14, 1  ;;  %p190_p2 = scmp.lt.s32.totalorder %s662_s14, 3 }
  0x18   : > { %s147_s6 = scalar_lea.sflag [#allocation4], %s146_s25  ;;  %s181_s15 = scalar_lea.hbm %s814_s1, %s444_s27 }
  0x19   : > { %457 = dma.hbm_to_vmem [thread:$0]  (!%p455_p0), %s161_s5, 128, %s163_s4, %s147_s6  }
  0x1a   : > { %p191_p3 = pnand %p436_p1, %p190_p2  ;;  %s173_s16 = scalar_lea.vmem [#allocation6], %s430_s26 }
  0x1b   : > { %s185_s18 = sshll.u32 %s173_s16, 4  ;;  %s183_s20 = sshll.u32 %s181_s15, 4  ;;  %s186_s18 = int_to_ptr.vmem [resolvable:$true] %s185_s18  ;;  %s184_s20 = int_to_ptr.hbm [resolvable:$true] %s183_s20 }
  0x1c   : > { %s170_s28 = scalar_lea.sflag [#allocation7], %s146_s25  ;;  %194 = sbr.rel (%p191_p3) target bundleno = 252 (0xfc), region = 28 }
  0x1d   : > { %460 = dma.hbm_to_vmem [thread:$0]  (!%p455_p0), %s184_s20, 128, %s186_s18, %s170_s28  }
  0x1e   : > { %s757_s19 = sand.u32 (!%p191_p3), 1, %s646_s10  }
  0x1f   : > { %s760_s29 = sshll.u32 (!%p191_p3), %s757_s19, 3  ;;  %s197_s30 = scalar_lea.sflag (!%p191_p3), [#allocation4], %s757_s19 }
  0x20   : > { %s200_s3 = scalar_lea.vmem (!%p191_p3), [#allocation3], %s760_s29 }
  0x21   : > { %629 = dma.done.wait (%p727_p8), %s197_s30, 128  }
  0x22   : > { %631 = vsyncadd (%p727_p8), %s197_s30, 4294967168  ;;  %s207_s25 = scalar_lea.sflag [#allocation7], %s757_s19  ;;  %s210_s26 = scalar_lea.vmem [#allocation6], %s760_s29 }
  0x23   : > { %633 = dma.done.wait (%p727_p8), %s207_s25, 128  }
  0x24   : > { %635 = vsyncadd (%p727_p8), %s207_s25, 4294967168  ;;  %v664_v0 = vmov 0.0   ;;  %v247_v1 = vld [vmem:[%s200_s3] sm:$0xff]  ;;  %v248_v3 = vld [vmem:[%s210_s26] sm:$0xff]  ;;  %s441_s21 = sshll.u32 %s654_s12, 3  ;;  %s236_s6 = scalar_lea.vmem [#allocation8], %s760_s29 }
  0x25   : > { %243 = vst [vmem:[#allocation2 + $0x10] sm:$0xff] %v664_v0  ;;  %v249_v2 = vmul.f32 2.0, %v247_v1  ;;  %s308_s5 = scalar_lea.hbm %s815_s2, %s441_s21  ;;  %s310_s7 = sshll.u32 %s236_s6, 4  ;;  %s311_s7 = int_to_ptr.vmem [resolvable:$true] %s310_s7 }
  0x26   : > { %244 = vst [vmem:[#allocation2] sm:$0xff] %v664_v0  ;;  %s312_s8 = sshll.u32 %s308_s5, 4  ;;  %s297_s16 = scalar_lea.sflag [#allocation5], %s757_s19  ;;  %s313_s8 = int_to_ptr.hbm [resolvable:$true] %s312_s8 }
  0x27   : > { %245 = vst [vmem:[#allocation2 + $0x18] sm:$0xff] %v664_v0  ;;  %v250_v4 = vadd.f32 0.5, %v249_v2  ;;  %s590_s18 = sshra.s32 %s313_s8, 4  ;;  %s596_s30 = scalar_lea.hbm %s815_s2, 16  ;;  %s591_s18 = int_to_ptr.hbm [resolvable:$true] %s590_s18 }
  0x28   : > { %246 = vst [vmem:[#allocation2 + $0x8] sm:$0xff] %v664_v0  ;;  %s592_s20 = scalar_lea.hbm %s591_s18, 8  ;;  %p597_p7 = scmp.lt.s32.totalorder %s591_s18, %s815_s2 }
  0x29   : > { %v251_v5 = vsub.f32 %v250_v4, %v248_v3  ;;  %p593_p4 = scmp.ne.s32.totalorder %s591_s18, %s592_s20  ;;  %p598_p8 = scmp.lt.s32.totalorder %s596_s30, %s592_s20 }
  0x2b   : > { %v256_v6 = vmul.f32 %v251_v5, %v251_v5  ;;  %p594_p5 = pnand %p593_p4, %p731_p9  ;;  %p599_p10 = por %p598_p8, %p597_p7 }
  0x2c   : > { %v252_v7 = vld [vmem:[#allocation2 + $0x10] sm:$0x3] }
  0x2d   : > { %258 = vst [vmem:[#allocation1] ss:$4 sm:$0xff] %v256_v6  ;;  %v253_v8 = vld [vmem:[#allocation2] sm:$0x3]  ;;  %p595_p6 = pneg %p594_p5 }
  0x2e   : > { %v254_v9 = vld [vmem:[#allocation2 + $0x18] sm:$0x3] }
  0x2f   : > { %v255_v10 = vld [vmem:[#allocation2 + $0x8] sm:$0x3]  ;;  %p600_p13 = pnand %p599_p10, %p595_p6 }
  0x34   : > { %v259_v11 = vld.sshfl [vmem:[#allocation1] sm:$0xff pattern:$0x73625140]  ;;  %v260_v12 = vld.sshfl [vmem:[#allocation1 + $0x8] sm:$0xff pattern:$0x73625140] }
  0x35   : > { %v261_v13 = vld.sshfl [vmem:[#allocation1 + $0x10] sm:$0xff pattern:$0x73625140]  ;;  %v262_v14 = vld.sshfl [vmem:[#allocation1 + $0x18] sm:$0xff pattern:$0x73625140]  ;;  %v267_v15 = vadd.f32 %v259_v11, %v252_v7  ;;  %v268_v16 = vadd.f32 %v260_v12, %v253_v8 }
  0x36   : > { %v269_v17 = vadd.f32 %v261_v13, %v254_v9  ;;  %v270_v18 = vadd.f32 %v262_v14, %v255_v10 }
  0x37   : > { %271 = vst [vmem:[#allocation2 + $0x10] sm:$0x3] %v267_v15 }
  0x38   : > { %272 = vst [vmem:[#allocation2] sm:$0x3] %v268_v16 }
  0x39   : > { %273 = vst [vmem:[#allocation2 + $0x18] sm:$0x3] %v269_v17 }
  0x3a   : > { %274 = vst [vmem:[#allocation2 + $0x8] sm:$0x3] %v270_v18 }
  0x3e   : > { %v278_v19 = vld [vmem:[#allocation2 + $0x10] sm:$0xff] }
  0x3f   : > { %v279_v20 = vld [vmem:[#allocation2] sm:$0xff] }
  0x40   : > { %v280_v21 = vld [vmem:[#allocation2 + $0x18] sm:$0xff]  ;;  %v282_v22 = vadd.f32 %v279_v20, %v278_v19 }
  0x41   : > { %v281_v23 = vld [vmem:[#allocation2 + $0x8] sm:$0xff] }
  0x42   : > { %v283_v24 = vadd.f32 %v282_v22, %v280_v21 }
  0x44   : > { %v284_v25 = vadd.f32 %v283_v24, %v281_v23 }
  0x46   : > { %285 = vadd.xlane.f32.xlu0 %v284_v25 }
  0xb9   : > { %v286_v26 = vpop.xlane.xlu0 %285 }
  0xba   : > { %v287_v27 = vrot.slane %v286_v26, 4 }
  0xbc   : > { %v288_v28 = vadd.f32 %v287_v27, %v286_v26 }
  0xbe   : > { %v289_v29 = vrot.slane %v288_v28, 2 }
  0xc0   : > { %v290_v30 = vadd.f32 %v289_v29, %v288_v28 }
  0xc2   : > { %v291_v31 = vrot.slane %v290_v30, 1 }
  0xc4   : > { %v292_v32 = vadd.f32 %v291_v31, %v290_v30 }
  0xc6   : > { %446 = vpush %v292_v32 }
  0xf7   : > { %s447_s15 = spop %446 }
  0xf8   : > { %v294_v33 = vstv %s447_s15 }
  0xf9   : > { %295 = vst [vmem:[%s236_s6] sm:$0xff] %v294_v33 }
  0xfa   : > { %603 = shalt.err (!%p600_p13)
}
  0xfb   : > { %452 = dma.vmem_to_hbm [thread:$0]  (%p731_p9), %s311_s7, 128, %s313_s8, %s297_s16  }
  0xfc PF: > { %s324_s19 = sand.u32 1, %s642_s9   ;;  %p462_p0 = pnand %p429_p12, %p738_p11 }
  0xfd   : > { %s325_s25 = scalar_lea.sflag [#allocation5], %s324_s19 }
  0xfe   : > { %p463_p1 = pneg %p462_p0 }
 0x100   : > { %637 = dma.done.wait (%p463_p1), %s325_s25, 128  }
 0x101   : > { %639 = vsyncadd (%p463_p1), %s325_s25, 4294967168  ;;  %s21_s14 = sadd.s32 1, %s662_s14   ;;  %s820_s9 = smov %s646_s10 }
 0x102   : > { %p18_p2 = scmp.ge.s32.totalorder %s21_s14, 4   ;;  %s821_s10 = smov %s650_s11 }
 0x103   : > { %s822_s11 = smov %s736_s23  ;;  %s823_s12 = smov %s658_s13 }
 0x104   : > { %s824_s13 = smov %s826_s17  ;;  %20 = sbr.rel (!%p18_p2) target bundleno = 8 (0x8), region = 94 }
 0x109   :  { %331 = vsyncpa [#allocation4], 1 }
 0x10a   :  { %333 = vsyncpa [#allocation4 + $0x1], 1 }
 0x10b   :  { %334 = vsyncpa [#allocation7], 1 }
 0x10c   :  { %336 = vsyncpa [#allocation7 + $0x1], 1 }
 0x10d   :  { %337 = vsyncpa [#allocation5], 1 }
 0x10e   :  { %339 = vsyncpa [#allocation5 + $0x1], 1 }

</bundles_post_ra>
